<compile_context>
chip_gen: v6e
topology: v6e:2x2x1
jax: 0.10.0
libtpu: 0.0.40
codegen_flags: <defaults>
</compile_context>

<pallas_src>
import functools

import jax
import jax.numpy as jnp
from jax.experimental import pallas as pl
from jax.experimental.pallas import tpu as pltpu


def _channel_pad_kernel(x_ref, o_ref, *, pad_lanes):
    """One grid step over a batch tile, fully lane-flattened.

    x_ref: (b_tile, C * HW)              -- downsampled activations, flattened
    o_ref: (b_tile, (C + 2*pad) * HW)    -- written once with a single wide store
    """
    x = x_ref[...]
    if pad_lanes == 0:
        o_ref[...] = x
    else:
        z = jnp.zeros((x.shape[0], pad_lanes), dtype=x.dtype)
        # Channel zero-padding in the flattened (C*HW) row-major layout is just
        # pad*HW zero lanes before and after the data: build the padded row in
        # registers and do one full-width, lane-dense store (no zero-fill +
        # partial-overwrite double store).
        o_ref[...] = jnp.concatenate([z, x, z], axis=-1)


def lambda_layer_shortcut(x_nchw, planes, *, vmem_budget_bytes=8 * 1024 * 1024):
    """F.pad(x[:, :, ::2, ::2], (0,0,0,0, planes//4, planes//4), 'constant', 0)."""
    n, c, h, w = x_nchw.shape
    pad = planes // 4
    c_out = c + 2 * pad
    h_out = (h + 1) // 2          # matches PyTorch ::2 semantics for odd dims too
    w_out = (w + 1) // 2
    hw = h_out * w_out

    # glue: the stride-2 spatial subsampling is one fused XLA strided slice (it
    # only touches the even rows/cols, so no 2x over-read), followed by a free
    # row-major flatten.  Pulling the lane-compaction gather that ::2 implies
    # into the kernel would cost more XLU shuffle work than the roundtrip saves
    # at these CIFAR-sized shapes, so it stays as glue.
    x_flat = x_nchw[:, :, ::2, ::2].reshape(n, c * hw)

    itemsize = x_flat.dtype.itemsize
    bytes_per_sample = (c + c_out) * hw * itemsize
    # double-buffered input + output tiles must fit a small VMEM budget
    max_b = max(1, vmem_budget_bytes // (2 * bytes_per_sample))
    if n <= max_b:
        b_tile = n                          # full batch dim is always layout-legal
    else:
        b_tile = max(8, (max_b // 8) * 8)   # keep the sublane dim a multiple of 8
    grid = (pl.cdiv(n, b_tile),)

    kernel = functools.partial(_channel_pad_kernel, pad_lanes=pad * hw)

    out_flat = pl.pallas_call(
        kernel,
        out_shape=jax.ShapeDtypeStruct((n, c_out * hw), x_flat.dtype),
        grid_spec=pltpu.PrefetchScalarGridSpec(
            num_scalar_prefetch=0,
            grid=grid,
            # lane dim is never tiled (full C*HW / C_out*HW), so every block is
            # lane-dense and trivially satisfies the (8, 128) constraint.
            in_specs=[pl.BlockSpec((b_tile, c * hw), lambda b: (b, 0))],
            out_specs=pl.BlockSpec((b_tile, c_out * hw), lambda b: (b, 0)),
        ),
        compiler_params=pltpu.CompilerParams(
            dimension_semantics=("parallel",)),
    )(x_flat)

    # glue: contiguous (free) reshape back to the PyTorch NCHW output convention
    return out_flat.reshape(n, c_out, h_out, w_out)


if __name__ == "__main__":
    key = jax.random.PRNGKey(0)
    N, C, H, W = 2, 4, 16, 16
    planes = 8  # the lambda pads channels by planes // 4 on each side (no learned params)

    x = jax.random.normal(key, (N, C, H, W), dtype=jnp.float32)

    out = jax.block_until_ready(lambda_layer_shortcut(x, planes))

    # pure-JAX reference of the lambda: (N, C + 2*(planes//4), H//2, W//2)
    pad = planes // 4
    ref = jnp.pad(x[:, :, ::2, ::2], ((0, 0), (pad, pad), (0, 0), (0, 0)))

    assert out.shape == ref.shape, (out.shape, ref.shape)
    assert out.dtype == ref.dtype, (out.dtype, ref.dtype)
    assert jnp.array_equal(out, ref), "kernel output does not match reference"

    print("KERNEL_OK")
</pallas_src>

<mosaic_0001>
module attributes {stable_mosaic.version = 11 : i64} {
  func.func @_channel_pad_kernel(%arg0: i32, %arg1: memref<2x256xf32, #tpu.memory_space<vmem>>, %arg2: memref<2x512xf32, #tpu.memory_space<vmem>>) attributes {dimension_semantics = [#tpu.dimension_semantics<parallel>], iteration_bounds = array<i64: 1>, scalar_prefetch = 0 : i64, scratch_operands = 0 : i64, tpu.core_type = #tpu.core_type<tc>, window_params = [{transform_indices = @transform_0, window_bounds = array<i64: 2, 256>}, {transform_indices = @transform_1, window_bounds = array<i64: 2, 512>}]} {
    %c0 = arith.constant 0 : index
    %c0_0 = arith.constant 0 : index
    %0 = vector.load %arg1[%c0, %c0_0] : memref<2x256xf32, #tpu.memory_space<vmem>>, vector<2x256xf32>
    %cst = arith.constant 0.000000e+00 : f32
    %1 = vector.broadcast %cst : f32 to vector<2x128xf32>
    %2 = tpu.concatenate %1, %0, %1 in 1 : vector<2x128xf32>, vector<2x256xf32>, vector<2x128xf32> -> vector<2x512xf32>
    %c0_1 = arith.constant 0 : index
    %c0_2 = arith.constant 0 : index
    %3 = vector.load %arg2[%c0_1, %c0_2] : memref<2x512xf32, #tpu.memory_space<vmem>>, vector<2x512xf32>
    tpu.vector_store %arg2[%c0_1, %c0_2], %2 {strides = array<i32>} : memref<2x512xf32, #tpu.memory_space<vmem>>, vector<2x512xf32>,
    return
  }
  func.func @transform_0(%arg0: i32) -> (i32, i32) {
    %c0_i32 = arith.constant 0 : i32
    %c0_i32_0 = arith.constant 0 : i32
    return %arg0, %c0_i32 : i32, i32
  }
  func.func @transform_1(%arg0: i32) -> (i32, i32) {
    %c0_i32 = arith.constant 0 : i32
    %c0_i32_0 = arith.constant 0 : i32
    return %arg0, %c0_i32 : i32, i32
  }
}

</mosaic_0001>

<bundles_post_ra>
// kernel: tpu_custom_call.1
= control target key start
LH: loop header
LB: loop body
LE: loop exit
PB: predicated region body
PF: predicated region fallthrough
CT: control target
= control target key end

     0   :  { %6 = vsyncpa [#allocation3], 0  ;;  %s135_s0 = inlined_call_operand.hbm [shape: f32[2,256], index: 0, kind: input, shape index: {}]   ;;  %s136_s1 = inlined_call_operand.hbm [shape: f32[2,512], index: 1, kind: output, shape index: {}]  }
   0x1   :  { %7 = vsyncpa [#allocation4], 0  ;;  %s115_s6 = smov [#allocation2]  }
   0x2   :  { %s14_s7 = sshll.u32 %s115_s6, 4  ;;  %s15_s7 = int_to_ptr.vmem [resolvable:$true] %s14_s7 }
   0x3   :  { %s79_s8 = scalar_lea.vmem %s15_s7, 64  ;;  %p84_p1 = scmp.lt.s32.totalorder %s15_s7, %s15_s7 }
   0x4   :  { %p80_p0 = scmp.ne.s32.totalorder %s15_s7, %s79_s8  ;;  %p85_p2 = scmp.lt.s32.totalorder %s79_s8, %s79_s8 }
   0x6   :  { %p86_p3 = por %p85_p2, %p84_p1 }
   0x8   :  { %p87_p4 = pnand %p86_p3, %p80_p0 }
   0xa   :  { %90 = shalt.err (!%p87_p4)
}
   0xb   :  { %17 = dma.hbm_to_vmem [thread:$0]  %s135_s0, 64, %s15_s7, [#allocation3]  }
   0xc   :  { %111 = dma.done.wait [#allocation3], 64  }
   0xd   :  { %112 = vsyncadd [#allocation3], 4294967232  ;;  %v37_v0 = vlaneseq  ;;  %v116_v1 = vmov 1983009808   ;;  %v117_v8 = vmov 0.0   ;;  %s118_s11 = smov [#allocation5]  }
   0xe   :  { %v35_v2 = vunpack.c.l.s4 %v116_v1  ;;  %v66_v6 = vld.sshfl [vmem:[#allocation2] sm:$0x33 pattern:$0x76325410]  ;;  %s57_s12 = sshll.u32 %s118_s11, 4  ;;  %s58_s12 = int_to_ptr.vmem [resolvable:$true] %s57_s12 }
   0xf   :  { %v38_v3 = vshrl.u32 %v37_v0, 7  ;;  %v30_v7 = vcombine.high %v66_v6, %v66_v6  ;;  %v32_v9 = vcombine.low %v117_v8, %v66_v6  ;;  %s91_s0 = scalar_lea.vmem %s58_s12, 128  ;;  %p96_p6 = scmp.lt.s32.totalorder %s58_s12, %s58_s12 }
  0x10   :  { %v36_v4 = vunpack.c.0.s8 %v35_v2  ;;  %p92_p5 = scmp.ne.s32.totalorder %s58_s12, %s91_s0  ;;  %p97_p7 = scmp.lt.s32.totalorder %s91_s0, %s91_s0 }
  0x11   :  { %v33_v10 = vcombine.low %v30_v7, %v117_v8 }
  0x12   :  { %v39_v5 = vsub.s32 %v36_v4, %v38_v3  ;;  %p98_p8 = por %p97_p7, %p96_p6 }
  0x14   :  { %v40_v11 = vrot.slane %v32_v9, %v39_v5  ;;  %v47_v12 = vrot.slane %v33_v10, %v39_v5  ;;  %p99_p9 = pnand %p98_p8, %p92_p5 }
  0x16   :  { %v48_v13 = vcombine.low %v40_v11, %v47_v12 }
  0x18   :  { %50 = vst [vmem:[#allocation5] sm:$0xff] %v48_v13 }
  0x19   :  { %102 = shalt.err (!%p99_p9)
}
  0x1a   :  { %60 = dma.vmem_to_hbm [thread:$0]  %s58_s12, 128, %s136_s1, [#allocation4]  }
  0x1b   :  { %113 = dma.done.wait [#allocation4], 128  }
  0x1c   :  { %114 = vsyncadd [#allocation4], 4294967168 }
  0x1d   :  { %64 = vsyncpa [#allocation3], 1 }
  0x1e   :  { %65 = vsyncpa [#allocation4], 1 }

</bundles_post_ra>
